<compile_context>
chip_gen: v7x
topology: tpu7x:2x2x1
jax: 0.10.0
libtpu: 0.0.40
codegen_flags: <defaults>
</compile_context>

<pallas_src>
import functools

import jax
import jax.numpy as jnp
from jax.experimental import pallas as pl
from jax.experimental.pallas import tpu as pltpu


def _round_up(x: int, m: int) -> int:
    return (x + m - 1) // m * m


@functools.lru_cache(maxsize=None)
def _default_vmem_limit_bytes() -> int:
    # 3/4 of physical per-core VMEM: 48 MiB on v7x (64 MiB), 96 MiB on v5e/v6e
    # (128 MiB).  Falls back to the v7x-safe value if the query is unavailable.
    try:
        return int(pltpu.get_tpu_info().vmem_capacity_bytes * 3 // 4)
    except Exception:
        return 48 * 1024 * 1024


def fc_kernel(emb_ref, w_ref, b_ref, out_ref):
    # emb_ref : (tile_n, D)          activations for this row tile
    # w_ref   : (tile_items, D)      fc weight rows for this item tile (row-major)
    # b_ref   : (1, tile_items)      fc bias slice (f32)
    # out_ref : (tile_n, tile_items) logits
    logits = jax.lax.dot_general(
        emb_ref[...], w_ref[...],
        dimension_numbers=(((1,), (1,)), ((), ())),   # contract D on both sides
        preferred_element_type=jnp.float32,           # f32 MXU accumulation
    )
    out_ref[...] = (logits + b_ref[...]).astype(out_ref.dtype)


@functools.partial(
    jax.jit,
    static_argnames=("tile_n", "tile_items", "out_dtype", "vmem_limit_bytes"))
def _item2vec_forward_impl(input_data, emb_weight, fc_weight, fc_bias, *,
                           tile_n, tile_items, out_dtype, vmem_limit_bytes):
    B, S = input_data.shape
    num_items, latent_dim = emb_weight.shape
    N = B * S

    # Embedding gather (O(N*D) bytes) with XLA; clamp OOB ids deterministically
    # (PyTorch would raise).
    idx = jnp.clip(input_data.reshape(N).astype(jnp.int32), 0, num_items - 1)
    emb = jnp.take(emb_weight, idx, axis=0)                   # (N, D)
    # Match the fc weight's streaming dtype (cheap: only N*D elements).  Weights are
    # NOT cast here -- pass them pre-cast (e.g. bf16) to avoid a per-call full copy.
    emb = emb.astype(fc_weight.dtype)

    bias2d = fc_bias.astype(jnp.float32).reshape(1, num_items)

    # Tile sizes: rows multiple of 8 (sublane), items multiple of 128 (lane).
    tn = _round_up(max(8, min(tile_n, _round_up(N, 8))), 8)
    ti = _round_up(max(128, min(tile_items, _round_up(num_items, 128))), 128)

    # cdiv grid; Pallas clips boundary blocks, so no padding of W/emb and no slicing
    # of the logits is needed.  Item axis is outermost (see module docstring).
    grid = (pl.cdiv(num_items, ti), pl.cdiv(N, tn))

    out = pl.pallas_call(
        fc_kernel,
        out_shape=jax.ShapeDtypeStruct((N, num_items), out_dtype),
        grid=grid,
        in_specs=[
            pl.BlockSpec((tn, latent_dim), lambda it, rt: (rt, 0)),  # activations
            pl.BlockSpec((ti, latent_dim), lambda it, rt: (it, 0)),  # fc weight rows
            pl.BlockSpec((1, ti), lambda it, rt: (0, it)),           # fc bias
        ],
        out_specs=pl.BlockSpec((tn, ti), lambda it, rt: (rt, it)),
        compiler_params=pltpu.CompilerParams(
            # No cross-step accumulation -> both axes independent; the outer (item)
            # parallel axis megacore-shards on v7x.
            dimension_semantics=("parallel", "parallel"),
            vmem_limit_bytes=vmem_limit_bytes,
        ),
    )(emb, fc_weight, bias2d)

    return out.reshape(B, S, num_items)


def item2vec_forward(input_data, emb_weight, fc_weight, fc_bias, *,
                     tile_n=512, tile_items=2048, out_dtype=jnp.float32,
                     vmem_limit_bytes=None):
    """Item2Vec forward: [B, S] int ids -> [B, S, num_items] logits."""
    if vmem_limit_bytes is None:
        vmem_limit_bytes = _default_vmem_limit_bytes()
    return _item2vec_forward_impl(
        input_data, emb_weight, fc_weight, fc_bias,
        tile_n=int(tile_n), tile_items=int(tile_items),
        out_dtype=jnp.dtype(out_dtype), vmem_limit_bytes=int(vmem_limit_bytes))


def _reference(input_data, emb_weight, fc_weight, fc_bias):
    return emb_weight[input_data] @ fc_weight.T + fc_bias


if __name__ == "__main__":
    key = jax.random.PRNGKey(0)

    # --- Check 1: module's small demo config, f32, tight tolerance --------------
    num_items, latent_dim, B, S = 64, 32, 2, 8
    k_emb, k_w, k_b, k_idx, key = jax.random.split(key, 5)
    emb_weight = jax.random.normal(k_emb, (num_items, latent_dim), jnp.float32)
    fc_weight = jax.random.normal(k_w, (num_items, latent_dim), jnp.float32) * 0.1
    fc_bias = jax.random.normal(k_b, (num_items,), jnp.float32) * 0.1
    input_data = jax.random.randint(k_idx, (B, S), 0, num_items, jnp.int32)

    out = jax.block_until_ready(
        item2vec_forward(input_data, emb_weight, fc_weight, fc_bias))
    ref = _reference(input_data, emb_weight, fc_weight, fc_bias)
    assert out.shape == (B, S, num_items)
    assert out.dtype == jnp.float32
    assert jnp.allclose(out, ref, atol=1e-5, rtol=1e-5)

    # --- Check 2: multi-tile cdiv grid with ragged tails in BOTH axes -----------
    num_items2, latent_dim2, B2, S2 = 300, 48, 3, 50        # N=150; nothing divides
    k_emb, k_w, k_b, k_idx, key = jax.random.split(key, 5)
    emb_weight2 = jax.random.normal(k_emb, (num_items2, latent_dim2), jnp.float32)
    fc_weight2 = jax.random.normal(k_w, (num_items2, latent_dim2), jnp.float32) * 0.1
    fc_bias2 = jax.random.normal(k_b, (num_items2,), jnp.float32) * 0.1
    input_data2 = jax.random.randint(k_idx, (B2, S2), 0, num_items2, jnp.int32)

    out2 = jax.block_until_ready(
        item2vec_forward(input_data2, emb_weight2, fc_weight2, fc_bias2,
                         tile_n=64, tile_items=128))        # 3 x 3 grid, partial tails
    ref2 = _reference(input_data2, emb_weight2, fc_weight2, fc_bias2)
    assert out2.shape == (B2, S2, num_items2)
    assert jnp.allclose(out2, ref2, atol=1e-4, rtol=1e-4)

    # --- Check 3: bf16 weight streaming (cast ONCE, outside the forward) + bf16
    #     logits; f32 accumulation stays inside the kernel -----------------------
    emb_weight2_bf16 = emb_weight2.astype(jnp.bfloat16)
    fc_weight2_bf16 = fc_weight2.astype(jnp.bfloat16)
    out3 = jax.block_until_ready(
        item2vec_forward(input_data2, emb_weight2_bf16, fc_weight2_bf16, fc_bias2,
                         out_dtype=jnp.bfloat16))
    assert out3.dtype == jnp.bfloat16
    assert jnp.allclose(out3.astype(jnp.float32), ref2, atol=5e-2, rtol=5e-2)

    print("KERNEL_OK")
</pallas_src>

<mosaic_0001>
module attributes {stable_mosaic.version = 11 : i64} {
  func.func @fc_kernel(%arg0: i32, %arg1: i32, %arg2: memref<16x32xf32, #tpu.memory_space<vmem>>, %arg3: memref<128x32xf32, #tpu.memory_space<vmem>>, %arg4: memref<1x128xf32, #tpu.memory_space<vmem>>, %arg5: memref<16x128xf32, #tpu.memory_space<vmem>>) attributes {dimension_semantics = [#tpu.dimension_semantics<parallel>, #tpu.dimension_semantics<parallel>], iteration_bounds = array<i64: 1, 1>, scalar_prefetch = 0 : i64, scratch_operands = 0 : i64, tpu.core_type = #tpu.core_type<tc>, window_params = [{transform_indices = @transform_0, window_bounds = array<i64: 16, 32>}, {transform_indices = @transform_1, window_bounds = array<i64: 128, 32>}, {transform_indices = @transform_2, window_bounds = array<i64: 1, 128>}, {transform_indices = @transform_3, window_bounds = array<i64: 16, 128>}]} {
    %c0 = arith.constant 0 : index
    %c0_0 = arith.constant 0 : index
    %0 = vector.load %arg2[%c0, %c0_0] : memref<16x32xf32, #tpu.memory_space<vmem>>, vector<16x32xf32>
    %c0_1 = arith.constant 0 : index
    %c0_2 = arith.constant 0 : index
    %1 = vector.load %arg3[%c0_1, %c0_2] : memref<128x32xf32, #tpu.memory_space<vmem>>, vector<128x32xf32>
    %cst = arith.constant dense<0.000000e+00> : vector<16x128xf32>
    %2 = tpu.matmul %0, %1, %cst {dimension_numbers = #tpu.dot_dimension_numbers<[1], [1], [0], [0], [0, 0, 1, 0], [], []>} : vector<16x32xf32>, vector<128x32xf32>, vector<16x128xf32> -> vector<16x128xf32>
    %c0_3 = arith.constant 0 : index
    %c0_4 = arith.constant 0 : index
    %3 = vector.load %arg4[%c0_3, %c0_4] : memref<1x128xf32, #tpu.memory_space<vmem>>, vector<1x128xf32>
    %4 = vector.broadcast %3 : vector<1x128xf32> to vector<16x128xf32>
    %5 = arith.addf %2, %4 : vector<16x128xf32>
    %c0_5 = arith.constant 0 : index
    %c0_6 = arith.constant 0 : index
    %6 = vector.load %arg5[%c0_5, %c0_6] : memref<16x128xf32, #tpu.memory_space<vmem>>, vector<16x128xf32>
    tpu.vector_store %arg5[%c0_5, %c0_6], %5 {strides = array<i32>} : memref<16x128xf32, #tpu.memory_space<vmem>>, vector<16x128xf32>,
    return
  }
  func.func @transform_0(%arg0: i32, %arg1: i32) -> (i32, i32) {
    %c0_i32 = arith.constant 0 : i32
    %c0_i32_0 = arith.constant 0 : i32
    return %arg1, %c0_i32 : i32, i32
  }
  func.func @transform_1(%arg0: i32, %arg1: i32) -> (i32, i32) {
    %c0_i32 = arith.constant 0 : i32
    %c0_i32_0 = arith.constant 0 : i32
    return %arg0, %c0_i32 : i32, i32
  }
  func.func @transform_2(%arg0: i32, %arg1: i32) -> (i32, i32) {
    %c0_i32 = arith.constant 0 : i32
    %c0_i32_0 = arith.constant 0 : i32
    return %c0_i32, %arg0 : i32, i32
  }
  func.func @transform_3(%arg0: i32, %arg1: i32) -> (i32, i32) {
    %c0_i32 = arith.constant 0 : i32
    return %arg1, %arg0 : i32, i32
  }
}

</mosaic_0001>

<bundles_post_ra>
// kernel: _item2vec_forward_impl.1
= control target key start
LH: loop header
LB: loop body
LE: loop exit
PB: predicated region body
PF: predicated region fallthrough
CT: control target
= control target key end

     0   :  { %vm40_vm0 = vcmask 261120   ;;  %s467_s0 = inlined_call_operand.vmem [shape: f32[16,32], index: 0, kind: input, shape index: {}]   ;;  %s468_s1 = inlined_call_operand.vmem [shape: f32[64,32], index: 1, kind: input, shape index: {}]   ;;  %s469_s2 = inlined_call_operand.vmem [shape: f32[1,64], index: 2, kind: input, shape index: {}]   ;;  %s470_s3 = inlined_call_operand.hbm [shape: f32[16,64], index: 3, kind: output, shape index: {}]  }
   0x1   :  { %v17_v0 = vld [vmem:[%s468_s1] sm:$0xff]  ;;  %v18_v1 = vld [vmem:[%s468_s1 + $0x8] sm:$0xff]  ;;  %v19_v2 = vld [vmem:[%s468_s1 + $0x10] sm:$0xff] }
   0x2   :  { %v260_v3 = vpack.c.bf16 %v18_v1, %v17_v0  ;;  %vm369_vm1 = vmpackc.low %vm40_vm0, %vm40_vm0  ;;  %v20_v5 = vld [vmem:[%s468_s1 + $0x18] sm:$0xff]  ;;  %v15_v7 = vld [vmem:[%s467_s0] sm:$0xff] }
   0x3   :  { %v266_v6 = vpack.c.bf16 %v20_v5, %v19_v2  ;;  %v21_v8 = vld [vmem:[%s468_s1 + $0x20] sm:$0xff]  ;;  %v22_v9 = vld [vmem:[%s468_s1 + $0x28] sm:$0xff]  ;;  %257 = vmatprep.mubr.msk.f32.mxu0 %vm40_vm0, %v15_v7 }
   0x4   :  { %262 = vmatprep.subr.msk.bf16.mxu0 %vm369_vm1, %v260_v3 }
   0x5   :  { %265 = vmatpush3.bf16.xpose.msk.msra.mxu0 %vm369_vm1, %v260_v3 }
   0x6   :  { %268 = vmatprep.subr.msk.bf16.mxu0 %vm369_vm1, %v266_v6 }
   0x7   :  { %8 = vsyncpa [#allocation3], 0  ;;  %v272_v10 = vpack.c.bf16 %v22_v9, %v21_v8  ;;  %v23_v11 = vld [vmem:[%s468_s1 + $0x30] sm:$0xff]  ;;  %v24_v12 = vld [vmem:[%s468_s1 + $0x38] sm:$0xff] }
   0x8   :  { %v278_v13 = vpack.c.bf16 %v24_v12, %v23_v11  ;;  %v25_v14 = vld [vmem:[%s468_s1 + $0x40] sm:$0xff]  ;;  %v26_v15 = vld [vmem:[%s468_s1 + $0x48] sm:$0xff]  ;;  %v27_v17 = vld [vmem:[%s468_s1 + $0x50] sm:$0xff] }
   0x9   :  { %v284_v16 = vpack.c.bf16 %v26_v15, %v25_v14  ;;  %v28_v18 = vld [vmem:[%s468_s1 + $0x58] sm:$0xff]  ;;  %v29_v20 = vld [vmem:[%s468_s1 + $0x60] sm:$0xff]  ;;  %v30_v21 = vld [vmem:[%s468_s1 + $0x68] sm:$0xff] }
   0xa   :  { %v290_v19 = vpack.c.bf16 %v28_v18, %v27_v17  ;;  %v296_v22 = vpack.c.bf16 %v30_v21, %v29_v20  ;;  %v31_v23 = vld [vmem:[%s468_s1 + $0x70] sm:$0xff]  ;;  %v32_v24 = vld [vmem:[%s468_s1 + $0x78] sm:$0xff]  ;;  %v16_v26 = vld [vmem:[%s467_s0 + $0x8] sm:$0xff]  ;;  %s335_s1 = smov [#allocation2]  }
   0xb   :  { %v302_v25 = vpack.c.bf16 %v32_v24, %v31_v23  ;;  %v188_v27 = vld [vmem:[%s469_s2] ss:$0 sm:$0xff]  ;;  %s177_s23 = sshll.u32 %s335_s1, 4  ;;  %s178_s23 = int_to_ptr.vmem [resolvable:$true] %s177_s23 }
   0xc   :  { %s311_s24 = scalar_lea.vmem %s178_s23, 256  ;;  %p316_p1 = scmp.lt.s32.totalorder %s178_s23, %s178_s23 }
   0xd   :  { %271 = vmatpush3.bf16.xpose.msk.msra.mxu0 %vm369_vm1, %v266_v6  ;;  %p312_p0 = scmp.ne.s32.totalorder %s178_s23, %s311_s24  ;;  %p317_p2 = scmp.lt.s32.totalorder %s311_s24, %s311_s24 }
   0xe   :  { %274 = vmatprep.subr.msk.bf16.mxu0 %vm369_vm1, %v272_v10 }
   0xf   :  { %p318_p3 = por %p317_p2, %p316_p1 }
  0x11   :  { %p319_p4 = pnand %p318_p3, %p312_p0 }
  0x15   :  { %277 = vmatpush3.bf16.xpose.msk.msra.mxu0 %vm369_vm1, %v272_v10 }
  0x16   :  { %280 = vmatprep.subr.msk.bf16.mxu0 %vm369_vm1, %v278_v13 }
  0x1d   :  { %283 = vmatpush3.bf16.xpose.msk.msra.mxu0 %vm369_vm1, %v278_v13 }
  0x1e   :  { %286 = vmatprep.subr.msk.bf16.mxu0 %vm369_vm1, %v284_v16 }
  0x25   :  { %289 = vmatpush3.bf16.xpose.msk.msra.mxu0 %vm369_vm1, %v284_v16 }
  0x26   :  { %292 = vmatprep.subr.msk.bf16.mxu0 %vm369_vm1, %v290_v19 }
  0x2d   :  { %295 = vmatpush3.bf16.xpose.msk.msra.mxu0 %vm369_vm1, %v290_v19 }
  0x2e   :  { %298 = vmatprep.subr.msk.bf16.mxu0 %vm369_vm1, %v296_v22 }
  0x35   :  { %301 = vmatpush3.bf16.xpose.msk.msra.mxu0 %vm369_vm1, %v296_v22 }
  0x36   :  { %304 = vmatprep.subr.msk.bf16.mxu0 %vm369_vm1, %v302_v25 }
  0x3d   :  { %307 = vmatpush3.bf16.xpose.msk.msra.mxu0 %vm369_vm1, %v302_v25 }
  0x44   :  { %258 = vmatmul.mubr.msk.f32.vlgmr.msra.gmra.mrb[0].mxu0 %vm40_vm0, %v16_v26 }
 0x117   :  { %v259_v28 = vpop.f32.mrb[0].mxu0 }
 0x118   :  { %v167_v29 = vadd.f32 %v259_v28, %v188_v27  ;;  %v161_v30 = vpop.f32.mrb[1].mxu0 }
 0x119   :  { %v162_v31 = vadd.f32 %v188_v27, %v161_v30 }
 0x11a   :  { %171 = vst [vmem:[#allocation2 + $0x8] sm:$0xff] %v167_v29 }
 0x11b   :  { %170 = vst [vmem:[#allocation2] sm:$0xff] %v162_v31 }
 0x11c   :  { %322 = shalt.err (!%p319_p4)
}
 0x11d   :  { %s323_s2 = scalar_lea.hbm %s470_s3, 256 }
 0x11e   :  { %p324_p5 = scmp.ne.s32.totalorder %s470_s3, %s323_s2  ;;  %p327_p6 = scmp.lt.u32.totalorder %s323_s2, %s470_s3 }
 0x120   :  { %p329_p7 = pnand %p327_p6, %p324_p5 }
 0x122   :  { %332 = shalt.err (!%p329_p7)
}
 0x123   :  { %s336_s30 = smov 128   ;;  %s337_s4 = smov 8  }
 0x124   :  { %183 = dma.vmem_to_hbm [thread:$0]  %s178_s23, 256, %s470_s3, [#allocation3], %s336_s30, %s336_s30, %s337_s4  }
 0x125   :  { %333 = dma.done.wait [#allocation3], 256  }
 0x126   :  { %334 = vsyncadd [#allocation3], 4294967040 }
 0x127   :  { %187 = vsyncpa [#allocation3], 1 }

</bundles_post_ra>
